<compile_context>
chip_gen: v7x
topology: tpu7x:2x2x1
jax: 0.10.0
libtpu: 0.0.40
codegen_flags: <defaults>
</compile_context>

<pallas_src>
import jax
import jax.numpy as jnp
from jax.experimental import pallas as pl
from jax.experimental.pallas import tpu as pltpu

_MiB = 1024 * 1024


# ----------------------------------------------------------------------------
# Kernel
# ----------------------------------------------------------------------------
def _qlinear_kernel(x_ref, wq_ref, sb_ref, o_ref, acc_ref):
    """One (tm, tn) output tile, reduced over the K grid axis.

    x_ref:   (tm, tk)  bf16 activation tile
    wq_ref:  (tn, tk)  int8 quantized weight tile
    sb_ref:  (2, tn)   f32 [scale; bias] for this output-feature tile
    o_ref:   (tm, tn)  output tile (input dtype)
    acc_ref: (tm, tn)  f32 accumulator scratch
    """
    k = pl.program_id(2)

    @pl.when(k == 0)
    def _():
        acc_ref[...] = jnp.zeros_like(acc_ref)

    # Hot loop: int8 -> bf16 cast only (exact for int8 range); per-row dequant
    # scale is deferred to the finalize step (commutes with the K reduction).
    w = wq_ref[...].astype(jnp.bfloat16)  # (tn, tk)
    acc_ref[...] += jax.lax.dot_general(
        x_ref[...],
        w,
        dimension_numbers=(((1,), (1,)), ((), ())),  # contract over K (trans_b)
        preferred_element_type=jnp.float32,
    )

    @pl.when(k == pl.num_programs(2) - 1)
    def _():
        scale = sb_ref[0:1, :]  # (1, tn) f32
        bias = sb_ref[1:2, :]   # (1, tn) f32
        o_ref[...] = (acc_ref[...] * scale + bias).astype(o_ref.dtype)


# ----------------------------------------------------------------------------
# Trace-time tiling policy
# ----------------------------------------------------------------------------
def _round_up(x, m):
    return ((x + m - 1) // m) * m


def _chip_info():
    """Returns (megacore, vmem_limit_bytes, vmem_budget_bytes). Defensive."""
    kind = ""
    vmem_physical = None
    try:
        kind = jax.devices()[0].device_kind.lower()
    except Exception:
        pass
    try:
        info = pltpu.get_tpu_info()
        vmem_physical = getattr(info, "vmem_capacity_bytes", None)
    except Exception:
        pass

    is_v7 = ("7" in kind) or (
        vmem_physical is not None and vmem_physical <= 80 * _MiB
    )
    megacore = is_v7 or ("v4" in kind) or ("v5p" in kind)

    if is_v7:
        # v7x: 64 MiB physical VMEM per TensorCore.
        limit = 44 * _MiB
    elif ("v4" in kind) or ("v5" in kind) or ("v6" in kind) or (
        vmem_physical is not None and vmem_physical >= 120 * _MiB
    ):
        # v5e / v6e (and v4/v5p): 128 MiB physical VMEM.
        limit = 64 * _MiB
    else:
        # Unknown chip: stay within the common 32 MiB default scoped limit.
        limit = 32 * _MiB

    budget = limit - 4 * _MiB  # headroom for compiler-internal scratch
    return megacore, limit, budget


def _tile_candidates(dim, candidates):
    """Descending candidates dividing `dim`; fall back to the full extent."""
    cands = [c for c in candidates if c <= dim and dim % c == 0]
    return cands if cands else [dim]


def _vmem_footprint(tm, tn, tk, out_bytes):
    """Worst-case resident VMEM: double-buffered tiles + acc + bf16 cast temp."""
    x_t = tm * tk * 2          # bf16 activation tile
    w_t = tn * tk * 1          # int8 weight tile
    o_t = tm * tn * out_bytes  # output tile
    sb_t = 2 * tn * 4          # scale/bias tile
    acc = tm * tn * 4          # f32 accumulator scratch
    w_cast = tn * tk * 2       # bf16-cast weight temp inside the kernel
    return 2 * (x_t + w_t + o_t + sb_t) + acc + w_cast


def _select_tiles(M, N, K, out_bytes, megacore, budget):
    if M < 128:
        tm_opts = [_round_up(max(M, 1), 8)]
    else:
        tm_opts = [c for c in (512, 256, 128) if M >= c]
    tn_opts = _tile_candidates(N, (2048, 1024, 512, 256, 128))
    tk_opts = _tile_candidates(K, (2048, 1024, 512, 256, 128))

    tm, tn, tk = tm_opts[0], tn_opts[0], tk_opts[0]

    # v7x megacore: for decode-like shapes (single M block) make sure N has
    # >= 2 blocks so both TensorCores get sharded work. Single-TC chips just
    # take the largest tiles (no ">= 2 blocks" preference anywhere, and never
    # on the K reduction axis).
    if megacore and (-(-M // tm)) < 2:
        for c in tn_opts:
            if N // c >= 2:
                tn = c
                break

    # Shrink until the footprint fits the per-generation VMEM budget.
    while _vmem_footprint(tm, tn, tk, out_bytes) > budget:
        i_n, i_k, i_m = tn_opts.index(tn), tk_opts.index(tk), tm_opts.index(tm)
        can_n = i_n + 1 < len(tn_opts)
        can_k = i_k + 1 < len(tk_opts)
        can_m = i_m + 1 < len(tm_opts)
        if can_n and (tn >= tk or not can_k):
            tn = tn_opts[i_n + 1]
        elif can_k:
            tk = tk_opts[i_k + 1]
        elif can_m:
            tm = tm_opts[i_m + 1]
        else:
            break
    return tm, tn, tk


# ----------------------------------------------------------------------------
# Wrapper
# ----------------------------------------------------------------------------
@jax.jit
def quantized_linear(x, quant_w, weight_scale, bias):
    """W8A16 linear: Y = X @ (Wq * scale[:, None]).T + bias.

    x:            (..., in_features)          activations (any float dtype)
    quant_w:      (out_features, in_features) int8
    weight_scale: (out_features,)             per-output-row dequant scale
    bias:         (out_features,)             bias
    returns:      (..., out_features)         x.dtype
    """
    *lead, K = x.shape
    N, Kw = quant_w.shape
    assert K == Kw

    out_dtype = x.dtype
    out_bytes = jnp.dtype(out_dtype).itemsize
    x2d = x.reshape(-1, K).astype(jnp.bfloat16)
    M = x2d.shape[0]

    megacore, vmem_limit, vmem_budget = _chip_info()
    tm, tn, tk = _select_tiles(M, N, K, out_bytes, megacore, vmem_budget)

    M_pad = _round_up(M, tm)
    if M_pad != M:
        x2d = jnp.pad(x2d, ((0, M_pad - M), (0, 0)))

    # Per-output-feature scale and bias packed into one small f32 array,
    # consumed only at the finalize step.
    sb = jnp.concatenate(
        [
            weight_scale.reshape(1, N).astype(jnp.float32),
            bias.reshape(1, N).astype(jnp.float32),
        ],
        axis=0,
    )  # (2, N)

    grid = (M_pad // tm, N // tn, K // tk)

    cost = pl.CostEstimate(
        flops=2 * M_pad * N * K,
        transcendentals=0,
        bytes_accessed=(
            M_pad * K * 2 * (N // tn)       # bf16 x, re-read per N block
            + N * K * 1 * (M_pad // tm)     # int8 weight, re-read per M block
            + M_pad * N * out_bytes         # output write
            + 2 * N * 4                     # scale/bias
        ),
    )

    out = pl.pallas_call(
        _qlinear_kernel,
        out_shape=jax.ShapeDtypeStruct((M_pad, N), out_dtype),
        grid_spec=pltpu.PrefetchScalarGridSpec(
            num_scalar_prefetch=0,
            grid=grid,
            in_specs=[
                pl.BlockSpec((tm, tk), lambda i, j, k: (i, k)),  # x (bf16)
                pl.BlockSpec((tn, tk), lambda i, j, k: (j, k)),  # quant_w (int8)
                pl.BlockSpec((2, tn), lambda i, j, k: (0, j)),   # [scale; bias]
            ],
            out_specs=pl.BlockSpec((tm, tn), lambda i, j, k: (i, j)),
            scratch_shapes=[pltpu.VMEM((tm, tn), jnp.float32)],
        ),
        compiler_params=pltpu.CompilerParams(
            dimension_semantics=("parallel", "parallel", "arbitrary"),
            vmem_limit_bytes=int(vmem_limit),
        ),
        cost_estimate=cost,
    )(x2d, quant_w, sb)

    out = out[:M]
    return out.reshape(*lead, N)


# ----------------------------------------------------------------------------
# Param construction mirroring QuantizedLinear.__init__ (8-bit path)
# ----------------------------------------------------------------------------
def make_quantized_params(key, in_features, out_features, weight_bit_width=8):
    """Deterministically build (quant_w int8, scale f32, bias f32)."""
    assert weight_bit_width == 8
    # TODO(synk): weight_bit_width == 4 path (compress_int4_weight nibble
    # packing) is not implemented; only the 8-bit path is reproduced.
    kw, kb = jax.random.split(key)
    w_fp = jax.random.normal(kw, (out_features, in_features), dtype=jnp.float32) * 0.05
    qmax = 2 ** (weight_bit_width - 1) - 1  # 127
    scale = jnp.max(jnp.abs(w_fp), axis=-1) / qmax
    scale = jnp.maximum(scale, 1e-8)  # guard all-zero rows
    quant_w = jnp.clip(jnp.round(w_fp / scale[:, None]), -128, 127).astype(jnp.int8)
    bias = jax.random.normal(kb, (out_features,), dtype=jnp.float32) * 0.1
    # Keep scale/bias in float32 end-to-end (per review correctness note).
    return quant_w, scale.astype(jnp.float32), bias.astype(jnp.float32)


if __name__ == "__main__":
    key = jax.random.PRNGKey(0)
    k_x, k_p = jax.random.split(key)

    batch, seq = 2, 8
    in_features, out_features = 256, 256  # small, tile-aligned hidden sizes

    x = jax.random.normal(k_x, (batch, seq, in_features), dtype=jnp.float32).astype(
        jnp.bfloat16
    )
    quant_w, weight_scale, bias = make_quantized_params(
        k_p, in_features, out_features, weight_bit_width=8
    )

    out = quantized_linear(x, quant_w, weight_scale, bias)
    out = jax.block_until_ready(out)

    # Pure-JAX reference (dequantize weight, matmul, add bias) in f32.
    w_deq = quant_w.astype(jnp.float32) * weight_scale.astype(jnp.float32)[:, None]
    ref = (
        x.astype(jnp.float32).reshape(-1, in_features) @ w_deq.T
        + bias.astype(jnp.float32)[None, :]
    ).reshape(batch, seq, out_features)

    err = jnp.max(jnp.abs(out.astype(jnp.float32) - ref))
    assert out.shape == (batch, seq, out_features), out.shape
    assert err < 5e-2, f"max abs err too large: {err}"

    print("KERNEL_OK")
</pallas_src>

<mosaic_0001>
module attributes {stable_mosaic.version = 11 : i64} {
  func.func @_qlinear_kernel(%arg0: i32, %arg1: i32, %arg2: i32, %arg3: memref<16x256xbf16, #tpu.memory_space<vmem>>, %arg4: memref<256x256xi8, #tpu.memory_space<vmem>>, %arg5: memref<2x256xf32, #tpu.memory_space<vmem>>, %arg6: memref<16x256xbf16, #tpu.memory_space<vmem>>, %arg7: memref<16x256xf32, #tpu.memory_space<vmem>>) attributes {dimension_semantics = [#tpu.dimension_semantics<parallel>, #tpu.dimension_semantics<parallel>, #tpu.dimension_semantics<arbitrary>], iteration_bounds = array<i64: 1, 1, 1>, scalar_prefetch = 0 : i64, scratch_operands = 1 : i64, tpu.core_type = #tpu.core_type<tc>, window_params = [{transform_indices = @transform_0, window_bounds = array<i64: 16, 256>}, {transform_indices = @transform_1, window_bounds = array<i64: 256, 256>}, {transform_indices = @transform_2, window_bounds = array<i64: 2, 256>}, {transform_indices = @transform_3, window_bounds = array<i64: 16, 256>}]} {
    %c0_i32 = arith.constant 0 : i32
    %0 = arith.cmpi eq, %arg2, %c0_i32 : i32
    %1 = arith.extui %0 : i1 to i32
    %c0_i32_0 = arith.constant 0 : i32
    %2 = arith.cmpi ne, %1, %c0_i32_0 : i32
    scf.if %2 {
      %cst_10 = arith.constant 0.000000e+00 : f32
      %13 = vector.broadcast %cst_10 : f32 to vector<16x256xf32>
      %c0_11 = arith.constant 0 : index
      %c0_12 = arith.constant 0 : index
      %14 = vector.load %arg7[%c0_11, %c0_12] : memref<16x256xf32, #tpu.memory_space<vmem>>, vector<16x256xf32>
      tpu.vector_store %arg7[%c0_11, %c0_12], %13 {strides = array<i32>} : memref<16x256xf32, #tpu.memory_space<vmem>>, vector<16x256xf32>,
    } else {
    }
    %c0 = arith.constant 0 : index
    %c0_1 = arith.constant 0 : index
    %3 = vector.load %arg4[%c0, %c0_1] : memref<256x256xi8, #tpu.memory_space<vmem>>, vector<256x256xi8>
    %4 = arith.sitofp %3 : vector<256x256xi8> to vector<256x256xbf16>
    %c0_2 = arith.constant 0 : index
    %c0_3 = arith.constant 0 : index
    %5 = vector.load %arg7[%c0_2, %c0_3] : memref<16x256xf32, #tpu.memory_space<vmem>>, vector<16x256xf32>
    %c0_4 = arith.constant 0 : index
    %c0_5 = arith.constant 0 : index
    %6 = vector.load %arg3[%c0_4, %c0_5] : memref<16x256xbf16, #tpu.memory_space<vmem>>, vector<16x256xbf16>
    %cst = arith.constant dense<0.000000e+00> : vector<16x256xf32>
    %7 = tpu.matmul %6, %4, %cst {dimension_numbers = #tpu.dot_dimension_numbers<[1], [1], [0], [0], [0, 0, 1, 0], [], []>} : vector<16x256xbf16>, vector<256x256xbf16>, vector<16x256xf32> -> vector<16x256xf32>
    %8 = arith.addf %5, %7 : vector<16x256xf32>
    %c0_6 = arith.constant 0 : index
    %c0_7 = arith.constant 0 : index
    %9 = vector.load %arg7[%c0_6, %c0_7] : memref<16x256xf32, #tpu.memory_space<vmem>>, vector<16x256xf32>
    tpu.vector_store %arg7[%c0_6, %c0_7], %8 {strides = array<i32>} : memref<16x256xf32, #tpu.memory_space<vmem>>, vector<16x256xf32>,
    %c0_i32_8 = arith.constant 0 : i32
    %10 = arith.cmpi eq, %arg2, %c0_i32_8 : i32
    %11 = arith.extui %10 : i1 to i32
    %c0_i32_9 = arith.constant 0 : i32
    %12 = arith.cmpi ne, %11, %c0_i32_9 : i32
    scf.if %12 {
      %c0_10 = arith.constant 0 : index
      %c0_11 = arith.constant 0 : index
      %13 = vector.load %arg5[%c0_10, %c0_11] : memref<2x256xf32, #tpu.memory_space<vmem>>, vector<1x256xf32>
      %c1 = arith.constant 1 : index
      %c0_12 = arith.constant 0 : index
      %14 = vector.load %arg5[%c1, %c0_12] : memref<2x256xf32, #tpu.memory_space<vmem>>, vector<1x256xf32>
      %c0_13 = arith.constant 0 : index
      %c0_14 = arith.constant 0 : index
      %15 = vector.load %arg7[%c0_13, %c0_14] : memref<16x256xf32, #tpu.memory_space<vmem>>, vector<16x256xf32>
      %16 = vector.broadcast %13 : vector<1x256xf32> to vector<16x256xf32>
      %17 = arith.mulf %15, %16 : vector<16x256xf32>
      %18 = vector.broadcast %14 : vector<1x256xf32> to vector<16x256xf32>
      %19 = arith.addf %17, %18 : vector<16x256xf32>
      %20 = arith.truncf %19 : vector<16x256xf32> to vector<16x256xbf16>
      %c0_15 = arith.constant 0 : index
      %c0_16 = arith.constant 0 : index
      %21 = vector.load %arg6[%c0_15, %c0_16] : memref<16x256xbf16, #tpu.memory_space<vmem>>, vector<16x256xbf16>
      tpu.vector_store %arg6[%c0_15, %c0_16], %20 {strides = array<i32>} : memref<16x256xbf16, #tpu.memory_space<vmem>>, vector<16x256xbf16>,
    } else {
    }
    return
  }
  func.func @transform_0(%arg0: i32, %arg1: i32, %arg2: i32) -> (i32, i32) {
    %c0_i32 = arith.constant 0 : i32
    return %arg0, %arg2 : i32, i32
  }
  func.func @transform_1(%arg0: i32, %arg1: i32, %arg2: i32) -> (i32, i32) {
    %c0_i32 = arith.constant 0 : i32
    return %arg1, %arg2 : i32, i32
  }
  func.func @transform_2(%arg0: i32, %arg1: i32, %arg2: i32) -> (i32, i32) {
    %c0_i32 = arith.constant 0 : i32
    %c0_i32_0 = arith.constant 0 : i32
    return %c0_i32, %arg1 : i32, i32
  }
  func.func @transform_3(%arg0: i32, %arg1: i32, %arg2: i32) -> (i32, i32) {
    %c0_i32 = arith.constant 0 : i32
    return %arg0, %arg1 : i32, i32
  }
}

</mosaic_0001>

<bundles_post_ra>
// kernel: quantized_linear.1
= control target key start
LH: loop header
LB: loop body
LE: loop exit
PB: predicated region body
PF: predicated region fallthrough
CT: control target
= control target key end

     0   :  { %8 = vsyncpa [#allocation4], 0  ;;  %s349_s0 = inlined_call_operand.vmem [shape: bf16[16,256], index: 0, kind: input, shape index: {}]   ;;  %s350_s1 = inlined_call_operand.hbm [shape: s8[256,256], index: 1, kind: input, shape index: {}]   ;;  %s351_s2 = inlined_call_operand.vmem [shape: f32[2,256], index: 2, kind: input, shape index: {}]   ;;  %s352_s3 = inlined_call_operand.hbm [shape: bf16[16,256], index: 3, kind: output, shape index: {}]  }
   0x1   :  { %9 = vsyncpa [#allocation5], 0  ;;  %s287_s12 = smov [#allocation3]   ;;  %s239_s16 = scalar_lea.hbm %s350_s1, 2048 }
   0x2   :  { %s17_s13 = sshll.u32 %s287_s12, 4  ;;  %p240_p0 = scmp.ne.s32.totalorder %s350_s1, %s239_s16  ;;  %s18_s13 = int_to_ptr.vmem [resolvable:$true] %s17_s13 }
   0x3   :  { %p243_p1 = scmp.lt.u32.totalorder %s239_s16, %s350_s1 }
   0x5   :  { %p245_p2 = pnand %p243_p1, %p240_p0 }
   0x7   :  { %248 = shalt.err (!%p245_p2)
}
   0x8   :  { %s249_s21 = scalar_lea.vmem %s18_s13, 2048  ;;  %p254_p4 = scmp.lt.s32.totalorder %s18_s13, %s18_s13 }
   0x9   :  { %p250_p3 = scmp.ne.s32.totalorder %s18_s13, %s249_s21  ;;  %p255_p5 = scmp.lt.s32.totalorder %s249_s21, %s249_s21 }
   0xb   :  { %p256_p6 = por %p255_p5, %p254_p4 }
   0xd   :  { %p257_p7 = pnand %p256_p6, %p250_p3 }
   0xf   :  { %260 = shalt.err (!%p257_p7)
}
  0x10   :  { %s288_s22 = smov 256   ;;  %s289_s23 = smov 16  }
  0x11   :  { %23 = dma.hbm_to_vmem [thread:$0]  %s350_s1, 2048, %s18_s13, [#allocation4], %s288_s22, %s288_s22, %s289_s23  }
  0x12   :  { %283 = dma.done.wait [#allocation4], 2048  }
  0x13   :  { %284 = vsyncadd [#allocation4], 4294965248  ;;  %v38_v0 = vld [vmem:[#allocation3 + $0x8] sm:$0xff]  ;;  %v37_v1 = vld [vmem:[#allocation3] sm:$0xff]  ;;  %v163_v50 = vlaneseq }
  0x14   :  { %v54_v2 = vunpack.c.l.s8.bf16 %v38_v0  ;;  %v56_v3 = vunpack.c.h.s8.bf16 %v38_v0  ;;  %v53_v4 = vunpack.c.l.s8.bf16 %v37_v1  ;;  %v40_v5 = vld [vmem:[#allocation3 + $0x18] sm:$0xff]  ;;  %v238_v6 = vld [vmem:[%s349_s0 + $0x4] ss:$8 sps:$4 sm:$0xff]   ;;  %v55_v7 = vunpack.c.h.s8.bf16 %v37_v1  ;;  %v39_v9 = vld [vmem:[#allocation3 + $0x10] sm:$0xff] }
  0x15   :  { %133 = vmatprep.mubr.bf16.mxu0 %v238_v6  ;;  %v58_v8 = vunpack.c.l.s8.bf16 %v40_v5  ;;  %v57_v10 = vunpack.c.l.s8.bf16 %v39_v9  ;;  %v60_v11 = vunpack.c.h.s8.bf16 %v40_v5  ;;  %v42_v12 = vld [vmem:[#allocation3 + $0x28] sm:$0xff]  ;;  %v59_v13 = vunpack.c.h.s8.bf16 %v39_v9  ;;  %v41_v15 = vld [vmem:[#allocation3 + $0x20] sm:$0xff]  ;;  %v44_v18 = vld [vmem:[#allocation3 + $0x38] sm:$0xff] }
  0x16   :  { %101 = vmatprep.subr.bf16.mxu0 %v54_v2  ;;  %v62_v14 = vunpack.c.l.s8.bf16 %v42_v12  ;;  %v61_v16 = vunpack.c.l.s8.bf16 %v41_v15  ;;  %v64_v17 = vunpack.c.h.s8.bf16 %v42_v12  ;;  %v63_v19 = vunpack.c.h.s8.bf16 %v41_v15  ;;  %v43_v21 = vld [vmem:[#allocation3 + $0x30] sm:$0xff]  ;;  %v46_v24 = vld [vmem:[#allocation3 + $0x48] sm:$0xff]  ;;  %v45_v27 = vld [vmem:[#allocation3 + $0x40] sm:$0xff] }
  0x17   :  { %102 = vmatpush1.bf16.xpose.msra.mxu0 %v53_v4  ;;  %v66_v20 = vunpack.c.l.s8.bf16 %v44_v18  ;;  %v65_v22 = vunpack.c.l.s8.bf16 %v43_v21  ;;  %v68_v23 = vunpack.c.h.s8.bf16 %v44_v18  ;;  %v67_v25 = vunpack.c.h.s8.bf16 %v43_v21  ;;  %v48_v30 = vld [vmem:[#allocation3 + $0x58] sm:$0xff]  ;;  %v47_v33 = vld [vmem:[#allocation3 + $0x50] sm:$0xff]  ;;  %v50_v36 = vld [vmem:[#allocation3 + $0x68] sm:$0xff] }
  0x18   :  { %103 = vmatprep.subr.bf16.mxu0 %v56_v3  ;;  %v70_v26 = vunpack.c.l.s8.bf16 %v46_v24  ;;  %v69_v28 = vunpack.c.l.s8.bf16 %v45_v27  ;;  %v72_v29 = vunpack.c.h.s8.bf16 %v46_v24  ;;  %v71_v31 = vunpack.c.h.s8.bf16 %v45_v27  ;;  %v49_v39 = vld [vmem:[#allocation3 + $0x60] sm:$0xff]  ;;  %v52_v42 = vld [vmem:[#allocation3 + $0x78] sm:$0xff]  ;;  %v51_v45 = vld [vmem:[#allocation3 + $0x70] sm:$0xff] }
  0x19   :  { %v74_v32 = vunpack.c.l.s8.bf16 %v48_v30  ;;  %v73_v34 = vunpack.c.l.s8.bf16 %v47_v33  ;;  %v76_v35 = vunpack.c.h.s8.bf16 %v48_v30  ;;  %v75_v37 = vunpack.c.h.s8.bf16 %v47_v33  ;;  %v236_v49 = vld [vmem:[%s349_s0] ss:$8 sps:$4 sm:$0xff]   ;;  %s290_s0 = smov [#allocation6]  }
  0x1a   :  { %v78_v38 = vunpack.c.l.s8.bf16 %v50_v36  ;;  %v77_v40 = vunpack.c.l.s8.bf16 %v49_v39  ;;  %v80_v41 = vunpack.c.h.s8.bf16 %v50_v36  ;;  %v79_v43 = vunpack.c.h.s8.bf16 %v49_v39  ;;  %v155_v53 = vld [vmem:[%s351_s2] ss:$2 sm:$0x3]  ;;  %v225_v55 = vld [vmem:[%s351_s2 + $0x1] ss:$2 sm:$0x3] }
  0x1b   :  { %v82_v44 = vunpack.c.l.s8.bf16 %v52_v42  ;;  %v81_v46 = vunpack.c.l.s8.bf16 %v51_v45  ;;  %v84_v47 = vunpack.c.h.s8.bf16 %v52_v42  ;;  %v83_v48 = vunpack.c.h.s8.bf16 %v51_v45  ;;  %s211_s6 = sshll.u32 %s290_s0, 4  ;;  %s212_s6 = int_to_ptr.vmem [resolvable:$true] %s211_s6 }
  0x1c   :  { %v164_v51 = vshrl.u32 %v163_v50, 7  ;;  %s261_s2 = scalar_lea.vmem %s212_s6, 256  ;;  %p266_p9 = scmp.lt.s32.totalorder %s212_s6, %s212_s6 }
  0x1d   :  { %p262_p8 = scmp.ne.s32.totalorder %s212_s6, %s261_s2  ;;  %p267_p10 = scmp.lt.s32.totalorder %s261_s2, %s261_s2 }
  0x1e   :  { %v165_v52 = vsub.s32 0, %v164_v51  ;;  %v169_v54 = vsub.s32 1, %v164_v51 }
  0x1f   :  { %104 = vmatpush1.bf16.xpose.msra.mxu0 %v55_v7  ;;  %p268_p11 = por %p267_p10, %p266_p9 }
  0x20   :  { %105 = vmatprep.subr.bf16.mxu0 %v58_v8  ;;  %v166_v56 = vrot.slane %v155_v53, %v165_v52  ;;  %v170_v57 = vrot.slane %v155_v53, %v169_v54  ;;  %v181_v58 = vrot.slane %v225_v55, %v165_v52  ;;  %v185_v60 = vrot.slane %v225_v55, %v169_v54 }
  0x21   :  { %p269_p12 = pnand %p268_p11, %p262_p8 }
  0x27   :  { %106 = vmatpush1.bf16.xpose.msra.mxu0 %v57_v10 }
  0x28   :  { %107 = vmatprep.subr.bf16.mxu0 %v60_v11 }
  0x2f   :  { %108 = vmatpush1.bf16.xpose.msra.mxu0 %v59_v13 }
  0x30   :  { %109 = vmatprep.subr.bf16.mxu0 %v62_v14 }
  0x37   :  { %110 = vmatpush1.bf16.xpose.msra.mxu0 %v61_v16 }
  0x38   :  { %111 = vmatprep.subr.bf16.mxu0 %v64_v17 }
  0x3f   :  { %112 = vmatpush1.bf16.xpose.msra.mxu0 %v63_v19 }
  0x40   :  { %113 = vmatprep.subr.bf16.mxu0 %v66_v20 }
  0x47   :  { %114 = vmatpush1.bf16.xpose.msra.mxu0 %v65_v22 }
  0x48   :  { %115 = vmatprep.subr.bf16.mxu0 %v68_v23 }
  0x4f   :  { %116 = vmatpush1.bf16.xpose.msra.mxu0 %v67_v25 }
  0x50   :  { %117 = vmatprep.subr.bf16.mxu0 %v70_v26 }
  0x57   :  { %118 = vmatpush1.bf16.xpose.msra.mxu0 %v69_v28 }
  0x58   :  { %119 = vmatprep.subr.bf16.mxu0 %v72_v29 }
  0x5f   :  { %120 = vmatpush1.bf16.xpose.msra.mxu0 %v71_v31 }
  0x60   :  { %121 = vmatprep.subr.bf16.mxu0 %v74_v32 }
  0x67   :  { %122 = vmatpush1.bf16.xpose.msra.mxu0 %v73_v34 }
  0x68   :  { %123 = vmatprep.subr.bf16.mxu0 %v76_v35 }
  0x6f   :  { %124 = vmatpush1.bf16.xpose.msra.mxu0 %v75_v37 }
  0x70   :  { %125 = vmatprep.subr.bf16.mxu0 %v78_v38 }
  0x77   :  { %126 = vmatpush1.bf16.xpose.msra.mxu0 %v77_v40 }
  0x78   :  { %127 = vmatprep.subr.bf16.mxu0 %v80_v41 }
  0x7f   :  { %128 = vmatpush1.bf16.xpose.msra.mxu0 %v79_v43 }
  0x80   :  { %129 = vmatprep.subr.bf16.mxu0 %v82_v44 }
  0x87   :  { %130 = vmatpush1.bf16.xpose.msra.mxu0 %v81_v46 }
  0x88   :  { %131 = vmatprep.subr.bf16.mxu0 %v84_v47 }
  0x8f   :  { %132 = vmatpush1.bf16.xpose.msra.mxu0 %v83_v48 }
  0x96   :  { %134 = vmatmul.mubr.bf16.vlgmr.msra.gmra.mrb[0].mxu0 %v236_v49 }
 0x169   :  { %v135_v59 = vpop.f32.mrb[0].mxu0 }
 0x16a   :  { %v173_v61 = vmul.f32 %v166_v56, %v135_v59  ;;  %v137_v62 = vpop.f32.mrb[1].mxu0 }
 0x16b   :  { %v174_v63 = vmul.f32 %v170_v57, %v137_v62  ;;  %v139_v0 = vpop.f32.mrb[2].mxu0 }
 0x16c   :  { %v188_v1 = vadd.f32 %v181_v58, %v173_v61  ;;  %v175_v2 = vmul.f32 %v166_v56, %v139_v0  ;;  %v141_v3 = vpop.f32.mrb[3].mxu0 }
 0x16d   :  { %v189_v4 = vadd.f32 %v185_v60, %v174_v63  ;;  %v176_v5 = vmul.f32 %v170_v57, %v141_v3 }
 0x16e   :  { %v190_v6 = vadd.f32 %v181_v58, %v175_v2 }
 0x16f   :  { %v228_v7 = vpack.c.bf16 %v189_v4, %v188_v1  ;;  %v191_v8 = vadd.f32 %v185_v60, %v176_v5 }
 0x171   :  { %204 = vst [vmem:[#allocation6] sm:$0xff] %v228_v7  ;;  %v229_v9 = vpack.c.bf16 %v191_v8, %v190_v6 }
 0x173   :  { %205 = vst [vmem:[#allocation6 + $0x8] sm:$0xff] %v229_v9 }
 0x174   :  { %272 = shalt.err (!%p269_p12)
}
 0x175   :  { %s273_s9 = scalar_lea.hbm %s352_s3, 256 }
 0x176   :  { %p274_p13 = scmp.ne.s32.totalorder %s352_s3, %s273_s9  ;;  %p277_p0 = scmp.lt.u32.totalorder %s273_s9, %s352_s3 }
 0x178   :  { %p279_p1 = pnand %p277_p0, %p274_p13 }
 0x17a   :  { %282 = shalt.err (!%p279_p1)
}
 0x17b   :  { %s291_s14 = smov 128   ;;  %s292_s15 = smov 8  }
 0x17c   :  { %217 = dma.vmem_to_hbm [thread:$0]  %s212_s6, 256, %s352_s3, [#allocation5], %s291_s14, %s291_s14, %s292_s15  }
 0x17d   :  { %285 = dma.done.wait [#allocation5], 256  }
 0x17e   :  { %286 = vsyncadd [#allocation5], 4294967040 }
 0x17f   :  { %221 = vsyncpa [#allocation4], 1 }
 0x180   :  { %222 = vsyncpa [#allocation5], 1 }

</bundles_post_ra>
